<compile_context>
chip_gen: v6e
topology: v6e:2x2x1
jax: 0.10.0
libtpu: 0.0.40
codegen_flags: <defaults>
</compile_context>

<pallas_src>
import functools

import jax
import jax.numpy as jnp
import numpy as np
from jax.experimental import pallas as pl
from jax.experimental.pallas import tpu as pltpu

MIXTURE_DIM = 50
BLOCK_N = 1024  # sweepable: 512 / 1024 / 2048


def _round_up(a, b):
    return ((a + b - 1) // b) * b


def _flow_kernel(x_ref, cols_ref, lhs_ref, scal_ref, out_ref, *, mp):
    # x block is (2, BN): row 0 = x1, row 1 = x2 (batch along lanes).
    x1 = x_ref[0:1, :]                      # (1, BN)
    x2 = x_ref[1:2, :]                      # (1, BN)

    # inner_net Linear(9, 1) scalars + precomputed sum_c from SMEM:
    # [w0..w8, bias, sum_c1, sum_c2]
    iw0 = scal_ref[0]
    iw1 = scal_ref[1]
    iw2 = scal_ref[2]
    iw3 = scal_ref[3]
    iw4 = scal_ref[4]
    iw5 = scal_ref[5]
    iw6 = scal_ref[6]
    iw7 = scal_ref[7]
    iw8 = scal_ref[8]
    ib = scal_ref[9]
    sum_c1 = scal_ref[10]
    sum_c2 = scal_ref[11]

    # Per-lane polynomial features (lane-dense (1, BN) vectors).
    x1sq = x1 * x1
    x1cu = x1sq * x1
    sin1 = jnp.sin(x1)
    exp1 = jnp.exp(x1)

    # d_inner = d(x_inner)/d(x2); x_inner = iw0*x1 + iw1*x1^2 + iw2*x1^3 + x2*d_inner + b
    # (mathematically identical to stacking the 9 features + Linear(9,1)).
    d_inner = iw3 + iw4 * x1 + iw5 * x1sq + iw6 * x1cu + iw7 * sin1 + iw8 * exp1
    x_inner = iw0 * x1 + iw1 * x1sq + iw2 * x1cu + x2 * d_inner + ib   # (1, BN)

    # Half-scaled affine params, stacked [mixture1 ; mixture2] along sublanes.
    w1h = cols_ref[0:mp, 0:1]               # 0.5 * w1^2        (mp, 1)
    b1h = cols_ref[0:mp, 1:2]               # 0.5 * b1
    w2h = cols_ref[mp:2 * mp, 0:1]          # 0.5 * w2^2
    b2h = cols_ref[mp:2 * mp, 1:2]          # 0.5 * b2

    t1 = x1 * w1h + b1h                     # (mp, BN)
    t2 = x_inner * w2h + b2h                # (mp, BN)
    # One EUP tanh pass over both mixtures (sigmoid(t) = 0.5*tanh(0.5*t) + 0.5).
    u = jnp.tanh(jnp.concatenate([t1, t2], axis=0))       # (2*mp, BN)
    usq = u * u                                            # only remaining dense VPU op

    # Axis-0 reductions on the MXU (block-diagonal rows per mixture).
    wz = lhs_ref[0:8, :]                    # row0 = [wsm1 | 0], row1 = [0 | wsm2]
    wc = lhs_ref[8:16, :]                   # row0 = [c1   | 0], row1 = [0 | c2  ]
    zz = jnp.dot(wz, u, preferred_element_type=jnp.float32)     # (8, BN)
    mm = jnp.dot(wc, usq, preferred_element_type=jnp.float32)   # (8, BN)

    # sech^2 identity: z = 0.5*(wsm.u) + 0.5 ; m = 0.25*(sum_c - c.u^2)
    z1 = 0.5 * zz[0:1, :] + 0.5
    z2 = 0.5 * zz[1:2, :] + 0.5
    m1 = 0.25 * (sum_c1 - mm[0:1, :])
    m2 = (0.25 * jnp.abs(d_inner)) * (sum_c2 - mm[1:2, :])   # |d_inner| hoisted

    eps = jnp.float32(1e-8)
    m1 = jnp.where((z1 >= 0.0) & (z1 <= 1.0), m1, eps)
    m2 = jnp.where((z2 >= 0.0) & (z2 <= 1.0), m2, eps)

    # Single fused log + single dense (2, BN) store; -mean finished in the wrapper.
    out_ref[...] = jnp.log(jnp.concatenate([m1, m2], axis=0))


def init_params(key, mixture_dim=MIXTURE_DIM):
    """Deterministic parameter init mirroring the PyTorch module's shapes."""
    k = jax.random.split(key, 6)
    # NonNegativeLinear(1, M): weight (M, 1), bias (M,), U(-1, 1) (fan_in = 1)
    w1 = jax.random.uniform(k[0], (mixture_dim, 1), jnp.float32, -1.0, 1.0)
    b1 = jax.random.uniform(k[1], (mixture_dim,), jnp.float32, -1.0, 1.0)
    w2 = jax.random.uniform(k[2], (mixture_dim, 1), jnp.float32, -1.0, 1.0)
    b2 = jax.random.uniform(k[3], (mixture_dim,), jnp.float32, -1.0, 1.0)
    # mixture{1,2}_weights initialized to ones (as in __init__)
    mw1 = jnp.ones((mixture_dim,), jnp.float32)
    mw2 = jnp.ones((mixture_dim,), jnp.float32)
    # inner_net: Linear(9, 1), bound = 1/sqrt(9)
    bound = 1.0 / 3.0
    iw = jax.random.uniform(k[4], (1, 9), jnp.float32, -bound, bound)
    ib = jax.random.uniform(k[5], (1,), jnp.float32, -bound, bound)
    return dict(w1=w1, b1=b1, mw1=mw1, w2=w2, b2=b2, mw2=mw2, iw=iw, ib=ib)


def flow_forward(inp, params, block_n=BLOCK_N):
    """Pallas forward: returns scalar loss -mean(log(probs))."""
    inp = inp.astype(jnp.float32)
    n = inp.shape[0]
    m = params["w1"].shape[0]
    mp = _round_up(m, 8)                    # sublane-aligned mixture rows

    # Amortize per-grid-step overhead, but keep >= ~4 blocks when possible so
    # v7x's 2 TensorCores both get work via the "parallel" grid axis.
    block_n = min(block_n, max(256, _round_up(pl.cdiv(n, 4), 256)))
    n_blocks = pl.cdiv(n, block_n)
    n_pad = n_blocks * block_n

    # Lane-dense (2, N) layout: one contiguous input stream, no strided slices.
    x_t = inp.T                                               # (2, N)
    if n_pad != n:
        # Benign padding value; padded lanes are sliced off before the reduce.
        x_t = jnp.pad(x_t, ((0, 0), (0, n_pad - n)), constant_values=0.5)

    # ---- pre-fold the tiny per-mixture constants once (plain-JAX glue) ----
    w1sq = params["w1"].reshape(-1) ** 2
    b1 = params["b1"].reshape(-1)
    wsm1 = jax.nn.softmax(params["mw1"])
    c1 = w1sq * wsm1
    w2sq = params["w2"].reshape(-1) ** 2
    b2 = params["b2"].reshape(-1)
    wsm2 = jax.nn.softmax(params["mw2"])
    c2 = w2sq * wsm2

    # Packed columns (2*mp, 2): col0 = 0.5*w^2, col1 = 0.5*b, mixtures stacked.
    # Padded rows are zero -> tanh(0)=0 against zero dot-weights -> no contribution.
    cols = jnp.zeros((2 * mp, 2), jnp.float32)
    cols = cols.at[0:m, 0].set(0.5 * w1sq).at[mp:mp + m, 0].set(0.5 * w2sq)
    cols = cols.at[0:m, 1].set(0.5 * b1).at[mp:mp + m, 1].set(0.5 * b2)

    # Packed MXU lhs (16, 2*mp): rows 0/1 = block-diag softmax weights (z),
    # rows 8/9 = block-diag c = w^2 * softmax (m); remaining rows zero.
    lhs = jnp.zeros((16, 2 * mp), jnp.float32)
    lhs = lhs.at[0, 0:m].set(wsm1).at[1, mp:mp + m].set(wsm2)
    lhs = lhs.at[8, 0:m].set(c1).at[9, mp:mp + m].set(c2)

    # SMEM scalars: inner_net Linear(9,1) weights + bias, and the two sum_c.
    scal = jnp.concatenate(
        [params["iw"].reshape(-1), params["ib"].reshape(-1),
         jnp.sum(c1)[None], jnp.sum(c2)[None]]).astype(jnp.float32)   # (12,)

    kernel = functools.partial(_flow_kernel, mp=mp)
    out = pl.pallas_call(
        kernel,
        out_shape=jax.ShapeDtypeStruct((2, n_pad), jnp.float32),
        grid=(n_blocks,),
        in_specs=[pl.BlockSpec((2, block_n), lambda i: (0, i)),   # x (lane-dense)
                  pl.BlockSpec((2 * mp, 2), lambda i: (0, 0)),    # packed affine cols
                  pl.BlockSpec((16, 2 * mp), lambda i: (0, 0)),   # packed MXU lhs rows
                  pl.BlockSpec(memory_space=pltpu.MemorySpace.SMEM)],  # scalars
        out_specs=pl.BlockSpec((2, block_n), lambda i: (0, i)),
        compiler_params=pltpu.CompilerParams(
            dimension_semantics=("parallel",)),                   # shardable on v7x 2 TCs
    )(x_t, cols, lhs, scal)

    logp = out[:, :n]                                         # drop padded lanes
    return -jnp.sum(logp) / jnp.float32(2 * n)


def flow_forward_ref(inp, params):
    """Pure-JAX reference mirroring the PyTorch forward."""
    inp = inp.astype(jnp.float32)
    x1 = inp[:, 0:1]
    x2 = inp[:, 1:2]

    w1sq = (params["w1"] ** 2).T                              # (1, M)
    wsm1 = jax.nn.softmax(params["mw1"])                      # (M,)
    sig = jax.nn.sigmoid(x1 * w1sq + params["b1"][None, :])   # (N, M)
    z1 = sig @ wsm1                                           # (N,)
    m1 = ((sig - sig ** 2) * w1sq) @ wsm1                     # (N,)

    iw = params["iw"]                                         # (1, 9)
    feats = jnp.concatenate(
        [x1, x1 ** 2, x1 ** 3, x2, x2 * x1, x2 * x1 ** 2, x2 * x1 ** 3,
         x2 * jnp.sin(x1), x2 * jnp.exp(x1)], axis=1)         # (N, 9)
    x_inner = feats @ iw.T + params["ib"]                     # (N, 1)

    w2sq = (params["w2"] ** 2).T
    wsm2 = jax.nn.softmax(params["mw2"])
    sig2 = jax.nn.sigmoid(x_inner * w2sq + params["b2"][None, :])
    z2 = sig2 @ wsm2
    d_inner = (iw[0, 3] + iw[0, 4] * x1 + iw[0, 5] * x1 ** 2 + iw[0, 6] * x1 ** 3
               + iw[0, 7] * jnp.sin(x1) + iw[0, 8] * jnp.exp(x1))   # (N, 1)
    sig2 = (sig2 - sig2 ** 2) * w2sq * jnp.abs(d_inner)
    m2 = sig2 @ wsm2

    m1 = jnp.where((z1 >= 0) & (z1 <= 1), m1, 1e-8)
    m2 = jnp.where((z2 >= 0) & (z2 <= 1), m2, 1e-8)
    probs = jnp.stack([m1, m2], axis=1)                       # (N, 2)
    return -jnp.mean(jnp.log(probs))


if __name__ == "__main__":
    key = jax.random.PRNGKey(0)
    pkey, xkey = jax.random.split(key)
    params = init_params(pkey)

    # Small but >1 grid block (600 -> 3 blocks of 256 after the v7x cap,
    # with a ragged tail).
    N = 600
    inp = jax.random.uniform(xkey, (N, 2), jnp.float32, 0.0, 1.0)

    loss = jax.block_until_ready(flow_forward(inp, params))
    loss_ref = jax.block_until_ready(flow_forward_ref(inp, params))
    np.testing.assert_allclose(np.asarray(loss), np.asarray(loss_ref),
                               rtol=1e-4, atol=1e-5)
    print("KERNEL_OK")
</pallas_src>

<mosaic_0001>
module attributes {stable_mosaic.version = 11 : i64} {
  func.func @_flow_kernel(%arg0: i32, %arg1: memref<2x256xf32, #tpu.memory_space<vmem>>, %arg2: memref<112x2xf32, #tpu.memory_space<vmem>>, %arg3: memref<16x112xf32, #tpu.memory_space<vmem>>, %arg4: memref<12xf32, #tpu.memory_space<smem>>, %arg5: memref<2x256xf32, #tpu.memory_space<vmem>>) attributes {dimension_semantics = [#tpu.dimension_semantics<parallel>], iteration_bounds = array<i64: 3>, scalar_prefetch = 0 : i64, scratch_operands = 0 : i64, tpu.core_type = #tpu.core_type<tc>, window_params = [{transform_indices = @transform_0, window_bounds = array<i64: 2, 256>}, {pipeline_mode = #tpu.pipeline_mode<synchronous>, transform_indices = @transform_1, window_bounds = array<i64: 112, 2>}, {pipeline_mode = #tpu.pipeline_mode<synchronous>, transform_indices = @transform_2, window_bounds = array<i64: 16, 112>}, {transform_indices = @transform_3, window_bounds = array<i64: 12>}, {transform_indices = @transform_4, window_bounds = array<i64: 2, 256>}]} {
    %c0 = arith.constant 0 : index
    %c0_0 = arith.constant 0 : index
    %0 = vector.load %arg1[%c0, %c0_0] : memref<2x256xf32, #tpu.memory_space<vmem>>, vector<1x256xf32>
    %c1 = arith.constant 1 : index
    %c0_1 = arith.constant 0 : index
    %1 = vector.load %arg1[%c1, %c0_1] : memref<2x256xf32, #tpu.memory_space<vmem>>, vector<1x256xf32>
    %c0_2 = arith.constant 0 : index
    %2 = memref.load %arg4[%c0_2] : memref<12xf32, #tpu.memory_space<smem>>
    %c1_3 = arith.constant 1 : index
    %3 = memref.load %arg4[%c1_3] : memref<12xf32, #tpu.memory_space<smem>>
    %c2 = arith.constant 2 : index
    %4 = memref.load %arg4[%c2] : memref<12xf32, #tpu.memory_space<smem>>
    %c3 = arith.constant 3 : index
    %5 = memref.load %arg4[%c3] : memref<12xf32, #tpu.memory_space<smem>>
    %c4 = arith.constant 4 : index
    %6 = memref.load %arg4[%c4] : memref<12xf32, #tpu.memory_space<smem>>
    %c5 = arith.constant 5 : index
    %7 = memref.load %arg4[%c5] : memref<12xf32, #tpu.memory_space<smem>>
    %c6 = arith.constant 6 : index
    %8 = memref.load %arg4[%c6] : memref<12xf32, #tpu.memory_space<smem>>
    %c7 = arith.constant 7 : index
    %9 = memref.load %arg4[%c7] : memref<12xf32, #tpu.memory_space<smem>>
    %c8 = arith.constant 8 : index
    %10 = memref.load %arg4[%c8] : memref<12xf32, #tpu.memory_space<smem>>
    %c9 = arith.constant 9 : index
    %11 = memref.load %arg4[%c9] : memref<12xf32, #tpu.memory_space<smem>>
    %c10 = arith.constant 10 : index
    %12 = memref.load %arg4[%c10] : memref<12xf32, #tpu.memory_space<smem>>
    %c11 = arith.constant 11 : index
    %13 = memref.load %arg4[%c11] : memref<12xf32, #tpu.memory_space<smem>>
    %14 = arith.mulf %0, %0 : vector<1x256xf32>
    %15 = arith.mulf %14, %0 : vector<1x256xf32>
    %16 = math.sin %0 : vector<1x256xf32>
    %17 = math.exp %0 : vector<1x256xf32>
    %18 = vector.broadcast %6 : f32 to vector<1x256xf32>
    %19 = arith.mulf %18, %0 : vector<1x256xf32>
    %20 = vector.broadcast %5 : f32 to vector<1x256xf32>
    %21 = arith.addf %20, %19 : vector<1x256xf32>
    %22 = vector.broadcast %7 : f32 to vector<1x256xf32>
    %23 = arith.mulf %22, %14 : vector<1x256xf32>
    %24 = arith.addf %21, %23 : vector<1x256xf32>
    %25 = vector.broadcast %8 : f32 to vector<1x256xf32>
    %26 = arith.mulf %25, %15 : vector<1x256xf32>
    %27 = arith.addf %24, %26 : vector<1x256xf32>
    %28 = vector.broadcast %9 : f32 to vector<1x256xf32>
    %29 = arith.mulf %28, %16 : vector<1x256xf32>
    %30 = arith.addf %27, %29 : vector<1x256xf32>
    %31 = vector.broadcast %10 : f32 to vector<1x256xf32>
    %32 = arith.mulf %31, %17 : vector<1x256xf32>
    %33 = arith.addf %30, %32 : vector<1x256xf32>
    %34 = vector.broadcast %2 : f32 to vector<1x256xf32>
    %35 = arith.mulf %34, %0 : vector<1x256xf32>
    %36 = vector.broadcast %3 : f32 to vector<1x256xf32>
    %37 = arith.mulf %36, %14 : vector<1x256xf32>
    %38 = arith.addf %35, %37 : vector<1x256xf32>
    %39 = vector.broadcast %4 : f32 to vector<1x256xf32>
    %40 = arith.mulf %39, %15 : vector<1x256xf32>
    %41 = arith.addf %38, %40 : vector<1x256xf32>
    %42 = arith.mulf %1, %33 : vector<1x256xf32>
    %43 = arith.addf %41, %42 : vector<1x256xf32>
    %44 = vector.broadcast %11 : f32 to vector<1x256xf32>
    %45 = arith.addf %43, %44 : vector<1x256xf32>
    %c0_4 = arith.constant 0 : index
    %c0_5 = arith.constant 0 : index
    %46 = vector.load %arg2[%c0_4, %c0_5] : memref<112x2xf32, #tpu.memory_space<vmem>>, vector<56x1xf32>
    %c0_6 = arith.constant 0 : index
    %c1_7 = arith.constant 1 : index
    %47 = vector.load %arg2[%c0_6, %c1_7] : memref<112x2xf32, #tpu.memory_space<vmem>>, vector<56x1xf32>
    %c56 = arith.constant 56 : index
    %c0_8 = arith.constant 0 : index
    %48 = vector.load %arg2[%c56, %c0_8] : memref<112x2xf32, #tpu.memory_space<vmem>>, vector<56x1xf32>
    %c56_9 = arith.constant 56 : index
    %c1_10 = arith.constant 1 : index
    %49 = vector.load %arg2[%c56_9, %c1_10] : memref<112x2xf32, #tpu.memory_space<vmem>>, vector<56x1xf32>
    %50 = vector.broadcast %0 : vector<1x256xf32> to vector<56x256xf32>
    %51 = vector.broadcast %46 : vector<56x1xf32> to vector<56x256xf32>
    %52 = arith.mulf %50, %51 : vector<56x256xf32>
    %53 = vector.broadcast %47 : vector<56x1xf32> to vector<56x256xf32>
    %54 = arith.addf %52, %53 : vector<56x256xf32>
    %55 = vector.broadcast %45 : vector<1x256xf32> to vector<56x256xf32>
    %56 = vector.broadcast %48 : vector<56x1xf32> to vector<56x256xf32>
    %57 = arith.mulf %55, %56 : vector<56x256xf32>
    %58 = vector.broadcast %49 : vector<56x1xf32> to vector<56x256xf32>
    %59 = arith.addf %57, %58 : vector<56x256xf32>
    %60 = tpu.concatenate %54, %59 in 0 : vector<56x256xf32>, vector<56x256xf32> -> vector<112x256xf32>
    %61 = math.tanh %60 : vector<112x256xf32>
    %62 = arith.mulf %61, %61 : vector<112x256xf32>
    %c0_11 = arith.constant 0 : index
    %c0_12 = arith.constant 0 : index
    %63 = vector.load %arg3[%c0_11, %c0_12] : memref<16x112xf32, #tpu.memory_space<vmem>>, vector<8x112xf32>
    %c8_13 = arith.constant 8 : index
    %c0_14 = arith.constant 0 : index
    %64 = vector.load %arg3[%c8_13, %c0_14] : memref<16x112xf32, #tpu.memory_space<vmem>>, vector<8x112xf32>
    %cst = arith.constant dense<0.000000e+00> : vector<8x256xf32>
    %65 = tpu.matmul %63, %61, %cst {dimension_numbers = #tpu.dot_dimension_numbers<[1], [0], [0], [1], [0, 0, 1, 1], [], []>} : vector<8x112xf32>, vector<112x256xf32>, vector<8x256xf32> -> vector<8x256xf32>
    %cst_15 = arith.constant dense<0.000000e+00> : vector<8x256xf32>
    %66 = tpu.matmul %64, %62, %cst_15 {dimension_numbers = #tpu.dot_dimension_numbers<[1], [0], [0], [1], [0, 0, 1, 1], [], []>} : vector<8x112xf32>, vector<112x256xf32>, vector<8x256xf32> -> vector<8x256xf32>
    %67 = vector.extract_strided_slice %65 {offsets = [0, 0], sizes = [1, 256], strides = [1, 1]} : vector<8x256xf32> to vector<1x256xf32>
    %cst_16 = arith.constant 5.000000e-01 : f32
    %68 = vector.broadcast %cst_16 : f32 to vector<1x256xf32>
    %69 = arith.mulf %68, %67 : vector<1x256xf32>
    %cst_17 = arith.constant 5.000000e-01 : f32
    %70 = vector.broadcast %cst_17 : f32 to vector<1x256xf32>
    %71 = arith.addf %69, %70 : vector<1x256xf32>
    %72 = vector.extract_strided_slice %65 {offsets = [1, 0], sizes = [1, 256], strides = [1, 1]} : vector<8x256xf32> to vector<1x256xf32>
    %cst_18 = arith.constant 5.000000e-01 : f32
    %73 = vector.broadcast %cst_18 : f32 to vector<1x256xf32>
    %74 = arith.mulf %73, %72 : vector<1x256xf32>
    %cst_19 = arith.constant 5.000000e-01 : f32
    %75 = vector.broadcast %cst_19 : f32 to vector<1x256xf32>
    %76 = arith.addf %74, %75 : vector<1x256xf32>
    %77 = vector.extract_strided_slice %66 {offsets = [0, 0], sizes = [1, 256], strides = [1, 1]} : vector<8x256xf32> to vector<1x256xf32>
    %78 = vector.broadcast %12 : f32 to vector<1x256xf32>
    %79 = arith.subf %78, %77 : vector<1x256xf32>
    %cst_20 = arith.constant 2.500000e-01 : f32
    %80 = vector.broadcast %cst_20 : f32 to vector<1x256xf32>
    %81 = arith.mulf %80, %79 : vector<1x256xf32>
    %82 = math.absf %33 : vector<1x256xf32>
    %cst_21 = arith.constant 2.500000e-01 : f32
    %83 = vector.broadcast %cst_21 : f32 to vector<1x256xf32>
    %84 = arith.mulf %83, %82 : vector<1x256xf32>
    %85 = vector.extract_strided_slice %66 {offsets = [1, 0], sizes = [1, 256], strides = [1, 1]} : vector<8x256xf32> to vector<1x256xf32>
    %86 = vector.broadcast %13 : f32 to vector<1x256xf32>
    %87 = arith.subf %86, %85 : vector<1x256xf32>
    %88 = arith.mulf %84, %87 : vector<1x256xf32>
    %cst_22 = arith.constant 0.000000e+00 : f32
    %89 = vector.broadcast %cst_22 : f32 to vector<1x256xf32>
    %90 = arith.cmpf oge, %71, %89 : vector<1x256xf32>
    %cst_23 = arith.constant 1.000000e+00 : f32
    %91 = vector.broadcast %cst_23 : f32 to vector<1x256xf32>
    %92 = arith.cmpf ole, %71, %91 : vector<1x256xf32>
    %93 = arith.andi %90, %92 : vector<1x256xi1>
    %cst_24 = arith.constant 9.99999993E-9 : f32
    %94 = vector.broadcast %cst_24 : f32 to vector<1x256xf32>
    %95 = arith.select %93, %81, %94 : vector<1x256xi1>, vector<1x256xf32>
    %cst_25 = arith.constant 0.000000e+00 : f32
    %96 = vector.broadcast %cst_25 : f32 to vector<1x256xf32>
    %97 = arith.cmpf oge, %76, %96 : vector<1x256xf32>
    %cst_26 = arith.constant 1.000000e+00 : f32
    %98 = vector.broadcast %cst_26 : f32 to vector<1x256xf32>
    %99 = arith.cmpf ole, %76, %98 : vector<1x256xf32>
    %100 = arith.andi %97, %99 : vector<1x256xi1>
    %cst_27 = arith.constant 9.99999993E-9 : f32
    %101 = vector.broadcast %cst_27 : f32 to vector<1x256xf32>
    %102 = arith.select %100, %88, %101 : vector<1x256xi1>, vector<1x256xf32>
    %103 = tpu.concatenate %95, %102 in 0 : vector<1x256xf32>, vector<1x256xf32> -> vector<2x256xf32>
    %104 = math.log %103 : vector<2x256xf32>
    %c0_28 = arith.constant 0 : index
    %c0_29 = arith.constant 0 : index
    %105 = vector.load %arg5[%c0_28, %c0_29] : memref<2x256xf32, #tpu.memory_space<vmem>>, vector<2x256xf32>
    tpu.vector_store %arg5[%c0_28, %c0_29], %104 {strides = array<i32>} : memref<2x256xf32, #tpu.memory_space<vmem>>, vector<2x256xf32>,
    return
  }
  func.func @transform_0(%arg0: i32) -> (i32, i32) {
    %c0_i32 = arith.constant 0 : i32
    %c0_i32_0 = arith.constant 0 : i32
    return %c0_i32, %arg0 : i32, i32
  }
  func.func @transform_1(%arg0: i32) -> (i32, i32) {
    %c0_i32 = arith.constant 0 : i32
    %c0_i32_0 = arith.constant 0 : i32
    %c0_i32_1 = arith.constant 0 : i32
    return %c0_i32, %c0_i32_0 : i32, i32
  }
  func.func @transform_2(%arg0: i32) -> (i32, i32) {
    %c0_i32 = arith.constant 0 : i32
    %c0_i32_0 = arith.constant 0 : i32
    %c0_i32_1 = arith.constant 0 : i32
    return %c0_i32, %c0_i32_0 : i32, i32
  }
  func.func @transform_3(%arg0: i32) -> i32 {
    %c0_i32 = arith.constant 0 : i32
    %c0_i32_0 = arith.constant 0 : i32
    return %c0_i32 : i32
  }
  func.func @transform_4(%arg0: i32) -> (i32, i32) {
    %c0_i32 = arith.constant 0 : i32
    %c0_i32_0 = arith.constant 0 : i32
    return %c0_i32, %arg0 : i32, i32
  }
}

</mosaic_0001>

<bundles_post_ra>
// kernel: tpu_custom_call.1
= control target key start
LH: loop header
LB: loop body
LE: loop exit
PB: predicated region body
PF: predicated region fallthrough
CT: control target
= control target key end

     0   :  { %9 = vsyncpa [#allocation4], 0  ;;  %s1526_s0 = inlined_call_operand.vmem [shape: f32[2,768], index: 0, kind: input, shape index: {}]   ;;  %s1527_s1 = inlined_call_operand.vmem [shape: f32[112,2], index: 1, kind: input, shape index: {}]   ;;  %s1528_s2 = inlined_call_operand.vmem [shape: f32[16,112], index: 2, kind: input, shape index: {}]   ;;  %s1529_s3 = inlined_call_operand.vmem [shape: f32[12], index: 3, kind: input, shape index: {}]   ;;  %s1530_s4 = inlined_call_operand.hbm [shape: f32[2,768], index: 4, kind: output, shape index: {}]  }
   0x1   :  { %10 = vsyncpa [#allocation3], 0 }
   0x2   :  { %12 = vsyncpa [#allocation3 + $0x1], 0  ;;  %s1245_s15 = smov 0   ;;  %s1247_s16 = smov 0  }
   0x3   :  { %s1249_s17 = smov 0   ;;  %s1251_s18 = smov 0  }
   0x4 LB: > { %s1266_s19 = sadd.s32 4294967295, %s1206_s18   ;;  %s949_s20 = sadd.s32 4294967294, %s1206_s18   ;;  %s1206_s18 = sphi %s1251_s18, %s1539_s18   ;;  %s1202_s17 = sphi %s1249_s17, %s1538_s17   ;;  %s1198_s16 = sphi %s1247_s16, %s1537_s16   ;;  %s1194_s15 = sphi %s1245_s15, %s1536_s15  }
   0x5   : > { %s1270_s21 = sadd.s32 1, %s1206_s18   ;;  %s114_s22 = sadd.s32 1, %s1202_s17 }
   0x6   : > { %s111_s23 = ssub.s32 %s1206_s18, %s1270_s21  ;;  %p124_p0 = scmp.ne.s32.totalorder %s1202_s17, %s1198_s16 }
   0x7   : > { %p112_p1 = scmp.eq.s32.totalorder %s111_s23, 0  ;;  %p125_p2 = scmp.eq.s32.totalorder %s1266_s19, 2 }
   0x8   : > { %p130_p3 = scmp.ne.s32.totalorder %s1198_s16, %s1194_s15  ;;  %p131_p4 = scmp.eq.s32.totalorder %s949_s20, 2 }
   0x9   : > { %s1281_s24 = scalar_select %p112_p1, %s1202_s17, %s114_s22  }
   0xa   : > { %p1283_p5 = por %p125_p2, %p124_p0  ;;  %p1287_p6 = por %p131_p4, %p130_p3 }
   0xb   : > { %p950_p7 = scmp.ge.s32.totalorder %s1206_s18, 1  ;;  %p138_p8 = scmp.lt.s32.totalorder %s1206_s18, 4 }
   0xc   : > { %p1001_p9 = scmp.eq.s32.totalorder %s1266_s19, 0  ;;  %s157_s30 = sshll.u32 %s1529_s3, 4  ;;  %s158_s30 = int_to_ptr.vmem [resolvable:$true] %s157_s30 }
   0xd   : > { %p1294_p10 = pnand %p950_p7, %p138_p8  ;;  %s1127_s5 = scalar_lea.vmem %s158_s30, 16 }
   0xe   : > { %p1128_p13 = scmp.ne.s32.totalorder %s158_s30, %s1127_s5  ;;  %p1135_p3 = scmp.lt.s32.totalorder %s158_s30, %s158_s30 }
   0xf   : > { %p993_p11 = pneg %p1294_p10  ;;  %p1136_p4 = scmp.lt.s32.totalorder %s1127_s5, %s1127_s5 }
  0x11   : > { %p994_p12 = pnand %p1001_p9, %p993_p11  ;;  %p1137_p7 = por %p1136_p4, %p1135_p3 }
  0x13   : > { %p1129_p0 = pneg %p994_p12 }
  0x15   : > { %p1130_p1 = pnand %p1129_p0, %p1128_p13 }
  0x17   : > { %p1131_p2 = pneg %p1130_p1 }
  0x19   : > { %p1138_p8 = pnand %p1137_p7, %p1131_p2 }
  0x1b   : > { %1141 = shalt.err (!%p1138_p8)
}
  0x1c   : > { %s1208_s6 = smov [#allocation2]   ;;  %179 = sbr.rel (%p1294_p10) target bundleno = 502 (0x1f6), region = 36 }
  0x1d   : > { %996 = dma.vmem_to_smem (!%p994_p12), %s158_s30, 16, %s1208_s6, [#allocation4]  }
  0x21   : > { %1185 = dma.done.wait (%p1001_p9), [#allocation4], 16  }
  0x22   : > { %1187 = vsyncadd (%p1001_p9), [#allocation4], 4294967280 }
  0x23   : > { %185 = sfence }
  0x24   : > { %v377_v0 = vld [vmem:[%s1527_s1 + $0x68] sm:$0xff]  ;;  %v376_v1 = vld [vmem:[%s1527_s1 + $0x60] sm:$0xff]  ;;  %s956_s11 = sshll.u32 %s1266_s19, 1  ;;  %v1209_v2 = vmov 1   ;;  %v375_v3 = vld [vmem:[%s1527_s1 + $0x58] sm:$0xff]  ;;  %v1210_v4 = vmov 0  }
  0x25   : > { %1049 = vset.pattern.permute.xlu0 %v1209_v2  ;;  %1047 = vset.pattern.permute.xlu1 %v1209_v2  ;;  %p207_p10 = scmp.lt.s32.totalorder %s956_s11, 5  ;;  %v374_v6 = vld [vmem:[%s1527_s1 + $0x50] sm:$0xff]  ;;  %v373_v10 = vld [vmem:[%s1527_s1 + $0x48] sm:$0xff]  ;;  %v367_v19 = vld [vmem:[%s1527_s1 + $0x18] sm:$0xff]  ;;  %v1211_v21 = vmov 683565275  }
  0x26   : > { %565 = vperm.xlu1 %1047, %v377_v0   ;;  %561 = vperm.xlu0 %1049, %v376_v1   ;;  %v370_v14 = vld [vmem:[%s1527_s1 + $0x30] sm:$0xff]  ;;  %v1212_v23 = vmov 2475754826   ;;  %v1213_v25 = vmov 2131351028   ;;  %v372_v31 = vld [vmem:[%s1527_s1 + $0x40] sm:$0xff] }
  0x27   : > { %s1541_s11 = smov (!%p207_p10, %s956_s11), 5  ;;  %v1214_v27 = vmov 2102212464   ;;  %v1215_v29 = vmov 920167782   ;;  %v371_v45 = vld [vmem:[%s1527_s1 + $0x38] sm:$0xff] }
  0x28   : > { %s957_s14 = sshll.u32 %s1541_s11, 1  ;;  %v1216_v37 = vmov 1326507024   ;;  %s962_s7 = sld [smem:[#allocation2 + $0x4]]  ;;  %vm640_vm13 = vcmask 916480  }
  0x29   : > { %s1328_s23 = scalar_lea.vmem %s1526_s0, %s957_s14  ;;  %s961_s8 = sld [smem:[#allocation2 + $0x3]] }
  0x2a   : > { %1048 = vset.pattern.permute.xlu1 %v1210_v4  ;;  %1050 = vset.pattern.permute.xlu0 %v1210_v4  ;;  %v1331_v5 = vld [vmem:[%s1328_s23] ss:$2 sm:$0x3]  ;;  %s963_s9 = sld [smem:[#allocation2 + $0x5]]  ;;  %s203_s6 = sand.u32 1, %s1198_s16  }
  0x2b   : > { %523 = vperm.xlu0 %1050, %v377_v0   ;;  %513 = vperm.xlu1 %1048, %v375_v3   ;;  %v233_v7 = vand.u32 2139095040, %v1331_v5  ;;  %v230_v9 = vand.u32 2147483647, %v1331_v5  ;;  %vm232_vm7 = vcmp.lt.s32.totalorder %v1331_v5, 0  ;;  %s964_s10 = sld [smem:[#allocation2 + $0x6]]  ;;  %vm322_vm12 = vweird.f32 %v1331_v5 }
  0x2c   : > { %s216_s11 = sld [smem:[#allocation2]] }
  0x2d   : > { %v234_v8 = vshrl.u32 %v233_v7, 23  ;;  %v237_v13 = vand.u32 8388607, %v230_v9  ;;  %v369_v7 = vld [vmem:[%s1527_s1 + $0x28] sm:$0xff]  ;;  %vm1399_vm8 = vcmp.le.f32.partialorder %v230_v9, 0.7853982 }
  0x2e   : > { %v336_v9 = vstv %s962_s7  ;;  %s959_s12 = sld [smem:[#allocation2 + $0x1]]  ;;  %s955_s7 = sshll.u32 %s203_s6, 2 }
  0x2f   : > { %508 = vperm.xlu1 %1048, %v374_v6   ;;  %518 = vperm.xlu0 %1050, %v376_v1   ;;  %v970_v11 = vadd.s32 4294967169, %v234_v8  ;;  %v238_v17 = vor.u32 8388608, %v237_v13  ;;  %s1412_s13 = sld [smem:[#allocation2 + $0x2]] }
  0x30   : > { %s1414_s14 = sld [smem:[#allocation2 + $0x7]] }
  0x31   : > { %v240_v12 = vadd.s32 1, %v970_v11  ;;  %v278_v39 = vshll.u32 %v238_v17, 8  ;;  %v368_v11 = vld [vmem:[%s1527_s1 + $0x20] sm:$0xff]  ;;  %s1416_s20 = sld [smem:[#allocation2 + $0x8]] }
  0x32   : > { %s967_s22 = sld [smem:[#allocation2 + $0x9]] }
  0x33   : > { %1051 = vset.pattern.permute.xlu1 %v1209_v2  ;;  %503 = vperm.xlu0 %1050, %v373_v10   ;;  %vm241_vm0 = vcmp.gt.s32.totalorder %v240_v12, 0  ;;  %s969_s30 = sld [smem:[#allocation2 + $0xb]] }
  0x34   : > { %557 = vperm.xlu1 %1051, %v375_v3   ;;  %v242_v15 = vsel %vm241_vm0, %v240_v12, 0  ;;  %v364_v3 = vld [vmem:[%s1527_s1] sm:$0xff]  ;;  %s968_s5 = sld [smem:[#allocation2 + $0xa]] }
  0x35   : > { %v244_v16 = vand.u32 31, %v242_v15  ;;  %v243_v18 = vshrl.u32 %v242_v15, 5 }
  0x37   : > { %421 = vperm.xlu0 %1050, %v370_v14   ;;  %v245_v20 = vsub.s32 32, %v244_v16  ;;  %v247_v22 = vshll.u32 %v1211_v21, %v244_v16  ;;  %v250_v24 = vshll.u32 %v1212_v23, %v244_v16  ;;  %v253_v26 = vshll.u32 %v1213_v25, %v244_v16 }
  0x38   : > { %553 = vperm.xlu1 %1051, %v374_v6   ;;  %v256_v28 = vshll.u32 %v1214_v27, %v244_v16  ;;  %v259_v30 = vshll.u32 %v1215_v29, %v244_v16  ;;  %vm262_vm1 = vcmp.lt.s32.totalorder %v243_v18, 1  ;;  %vm265_vm2 = vcmp.lt.s32.totalorder %v243_v18, 4 }
  0x39   : > { %v246_v32 = vshrl.u32 %v1211_v21, %v245_v20  ;;  %v248_v33 = vshrl.u32 %v1212_v23, %v245_v20  ;;  %v251_v34 = vshrl.u32 %v1213_v25, %v245_v20  ;;  %v254_v35 = vshrl.u32 %v1214_v27, %v245_v20  ;;  %v365_v27 = vld [vmem:[%s1527_s1 + $0x8] sm:$0xff] }
  0x3a   : > { %v257_v36 = vshrl.u32 %v1215_v29, %v245_v20  ;;  %v260_v38 = vshrl.u32 %v1216_v37, %v245_v20  ;;  %vm263_vm3 = vcmp.lt.s32.totalorder %v243_v18, 2  ;;  %vm264_vm4 = vcmp.lt.s32.totalorder %v243_v18, 3 }
  0x3b   : > { %406 = vperm.xlu0 %1050, %v367_v19   ;;  %v249_v40 = vor.u32 %v248_v33, %v247_v22  ;;  %v252_v41 = vor.u32 %v251_v34, %v250_v24  ;;  %v255_v42 = vor.u32 %v254_v35, %v253_v26  ;;  %v366_v22 = vld [vmem:[%s1527_s1 + $0x10] sm:$0xff]  ;;  %v334_v37 = vmul.f32 1.442695, %v1331_v5 }
  0x3c   : > { %1052 = vset.pattern.permute.xlu1 %v1210_v4  ;;  %v258_v43 = vor.u32 %v257_v36, %v256_v28  ;;  %v261_v44 = vor.u32 %v260_v38, %v259_v30 }
  0x3d   : > { %498 = vperm.xlu1 %1052, %v372_v31   ;;  %v266_v46 = vsel %vm262_vm1, %v246_v32, %v249_v40  ;;  %v267_v47 = vsel %vm265_vm2, %v255_v42, 2102212464  ;;  %v270_v48 = vsel %vm262_vm1, %v249_v40, %v252_v41  ;;  %v274_v49 = vsel %vm262_vm1, %v252_v41, %v255_v42 }
  0x3e   : > { %v268_v50 = vsel %vm264_vm4, %v252_v41, %v267_v47  ;;  %v271_v51 = vsel %vm265_vm2, %v258_v43, 920167782  ;;  %v275_v52 = vsel %vm265_vm2, %v261_v44, 1326507024  ;;  %v337_v40 = vmul.f32 %v336_v9, %v1331_v5 }
  0x3f   : > { %1056 = vset.pattern.permute.xlu0 %v1209_v2  ;;  %v272_v53 = vsel %vm264_vm4, %v255_v42, %v271_v51  ;;  %v276_v54 = vsel %vm264_vm4, %v258_v43, %v275_v52  ;;  %v269_v55 = vsel %vm263_vm3, %v266_v46, %v268_v50  ;;  %v338_v41 = vstv %s961_s8  ;;  %s982_s8 = sshll.u32 %s1266_s19, 6 }
  0x40   : > { %549 = vperm.xlu0 %1056, %v373_v10   ;;  %v273_v56 = vsel %vm263_vm3, %v270_v48, %v272_v53  ;;  %v277_v57 = vsel %vm263_vm3, %v274_v49, %v276_v54  ;;  %v285_v62 = vmul.u32 %v278_v39, %v269_v55  ;;  %v340_v42 = vstv %s963_s9  ;;  %s205_s9 = scalar_lea.vmem [#allocation5], %s955_s7 }
  0x41   : > { %493 = vperm.xlu1 %1052, %v371_v45   ;;  %v1364_v58 = vmul.u32.u64.low %v278_v39, %v277_v57  ;;  %v1365_v59 = vmul.u32.u64.high %v278_v39, %v277_v57, %v1364_v58  ;;  %v1367_v60 = vmul.u32.u64.low %v278_v39, %v273_v56  ;;  %v1368_v61 = vmul.u32.u64.high %v278_v39, %v273_v56, %v1367_v60 }
  0x42   : > { %v228_v39 = vmul.f32 %v1331_v5, %v1331_v5  ;;  %v343_v47 = vstv %s964_s10  ;;  %v352_v49 = vstv %s216_s11  ;;  %v354_v50 = vstv %s959_s12  ;;  %s878_s10 = sshll.u32 %s205_s9, 4  ;;  %s879_s10 = int_to_ptr.vmem [resolvable:$true] %s878_s10 }
  0x43   : > { %vm287_vm5 = vc.u32 %v1365_v59, %v1367_v60  ;;  %v288_v63 = vadd.s32 1, %v1368_v61  ;;  %v286_v17 = vadd.s32 %v1367_v60, %v1365_v59  ;;  %v353_v57 = vmul.f32 %v352_v49, %v1331_v5 }
  0x44   : > { %463 = vperm.xlu0 %1056, %v370_v14   ;;  %v229_v44 = vmul.f32 %v228_v39, %v1331_v5  ;;  %v341_v46 = vmul.f32 %v340_v42, %v228_v39  ;;  %v355_v58 = vmul.f32 %v354_v50, %v228_v39  ;;  %vm844_vm4 = vcmask 1040384  }
  0x45   : > { %1053 = vset.pattern.permute.xlu1 %v1209_v2  ;;  %v289_v0 = vsel %vm287_vm5, %v288_v63, %v1368_v61  ;;  %v346_v61 = vstv %s1414_s14  ;;  %v357_v63 = vstv %s1412_s13  ;;  %s876_s13 = scalar_lea.hbm %s1530_s4, %s982_s8  ;;  %s864_s14 = scalar_lea.sflag [#allocation3], %s203_s6 }
  0x46   : > { %545 = vperm.xlu1 %1053, %v372_v31   ;;  %v290_v1 = vadd.s32 %v289_v0, %v285_v62  ;;  %v344_v54 = vmul.f32 %v343_v47, %v229_v44  ;;  %v349_v62 = vstv %s1416_s20  ;;  %s1142_s20 = scalar_lea.vmem %s879_s10, 64 }
  0x47   : > { %p1143_p9 = scmp.ne.s32.totalorder %s879_s10, %s1142_s20 }
  0x48   : > { %451 = vperm.xlu0 %1056, %v367_v19   ;;  %v291_v6 = vadd.s32 536870912, %v290_v1 }
  0x49   : > { %p1144_p11 = pnand %p1143_p9, %p1283_p5 }
  0x4a   : > { %541 = vperm.xlu1 %1053, %v371_v45   ;;  %v292_v8 = vshrl.u32 %v291_v6, 30  ;;  %v339_v45 = vadd.f32 %v338_v41, %v337_v40  ;;  %v1217_v6 = vmov 0.0  }
  0x4b   : > { %708 = vmatprep.mubr.f32.mxu0 %v1217_v6  ;;  %782 = vmatprep.mubr.f32.mxu1 %v1217_v6  ;;  %p1145_p12 = pneg %p1144_p11 }
  0x4c   : > { %1059 = vset.pattern.permute.xlu0 %v1210_v4  ;;  %v293_v10 = vshll.u32 %v292_v8, 30  ;;  %v316_v32 = vsub.s32 4, %v292_v8  ;;  %v342_v53 = vadd.f32 %v341_v46, %v339_v45 }
  0x4d   : > { %391 = vperm.xlu0 %1059, %v364_v3  }
  0x4e   : > { %1054 = vset.pattern.permute.xlu1 %v1210_v4  ;;  %v294_v12 = vsub.s32 %v290_v1, %v293_v10  ;;  %v317_v35 = vsel %vm232_vm7, %v316_v32, %v292_v8  ;;  %v345_v1 = vadd.f32 %v344_v54, %v342_v53  ;;  %v356_v10 = vadd.f32 %v355_v58, %v353_v57 }
  0x4f   : > { %416 = vperm.xlu1 %1054, %v369_v7  }
  0x50   : > { %v296_v13 = vsub.s32 0, %v294_v12 }
  0x51   : > { %1060 = vset.pattern.permute.xlu0 %v1209_v2 }
  0x52   : > { %v971_v14 = vmin.u32 %v296_v13, %v294_v12  ;;  %v958_v13 = vld [vmem:[%s1328_s23 + $0x1] ss:$2 sm:$0x3] }
  0x53   : > { %411 = vperm.xlu1 %1054, %v368_v11  }
  0x54   : > { %v298_v15 = vclz %v971_v14 }
  0x56   : > { %v972_v16 = vadd.s32 4294967294, %v298_v15 }
  0x57   : > { %1055 = vset.pattern.permute.xlu1 %v1209_v2 }
  0x58   : > { %459 = vperm.xlu1 %1055, %v369_v7   ;;  %vm973_vm6 = vcmp.lt.s32.totalorder %v972_v16, 0 }
  0x59   : > { %v301_v18 = vsel %vm973_vm6, 0, %v972_v16 }
  0x5a   : > { %v302_v19 = vsub.s32 32, %v301_v18  ;;  %v303_v20 = vshll.u32 %v294_v12, %v301_v18  ;;  %v306_v21 = vsub.s32 4294967266, %v301_v18  ;;  %v379_v18 = vlaneseq }
  0x5c   : > { %455 = vperm.xlu1 %1055, %v368_v11   ;;  %v304_v23 = vshrl.u32 %v286_v17, %v302_v19  ;;  %v307_v24 = vadd.s32 127, %v306_v21  ;;  %v358_v11 = vmul.f32 %v357_v63, %v229_v44  ;;  %v1428_v19 = vshrl.u32 %v379_v18, 7 }
  0x5e   : > { %v305_v25 = vor.u32 %v304_v23, %v303_v20  ;;  %v308_v26 = vshll.u32 %v307_v24, 23  ;;  %v359_v15 = vadd.f32 %v358_v11, %v356_v10  ;;  %v362_v20 = vstv %s967_s22  ;;  %s1219_s22 = smov [#allocation5]  }
  0x5f   : > { %v1431_v21 = vsub.s32 0, %v1428_v19  ;;  %s1146_s23 = sshll.u32 %s1219_s22, 4  ;;  %s1147_s23 = int_to_ptr.vmem [resolvable:$false] %s1146_s23 }
  0x60   : > { %1057 = vset.pattern.permute.xlu1 %v1210_v4  ;;  %v309_v28 = vor.u32 4788187, %v308_v26  ;;  %v312_v29 = vcvt.s32.f32 %v305_v25  ;;  %s1148_s19 = scalar_lea.vmem %s1147_s23, 128  ;;  %p1149_p13 = scmp.lt.s32.totalorder %s879_s10, %s1147_s23 }
  0x61   : > { %401 = vperm.xlu1 %1057, %v366_v22   ;;  %p1150_p0 = scmp.lt.s32.totalorder %s1148_s19, %s1142_s20 }
  0x62   : > { %v310_v30 = vand.u32 2147483647, %v309_v28 }
  0x63   : > { %p1151_p1 = por %p1150_p0, %p1149_p13 }
  0x64   : > { %v313_v31 = vmul.f32 %v312_v29, %v310_v30 }
  0x65   : > { %396 = vperm.xlu1 %1057, %v365_v27   ;;  %p1152_p2 = pnand %p1151_p1, %p1145_p12 }
  0x66   : > { %v314_v33 = vxor.u32 2147483648, %v313_v31 }
  0x68   : > { %v315_v34 = vsel %vm232_vm7, %v314_v33, %v313_v31 }
  0x69   : > { %1058 = vset.pattern.permute.xlu1 %v1209_v2  ;;  %v318_v36 = vsel %vm1399_vm8, %v1331_v5, %v315_v34  ;;  %v319_v2 = vsel %vm1399_vm8, 0, %v317_v35 }
  0x6a   : > { %447 = vperm.xlu1 %1058, %v366_v22   ;;  %1061 = vcosq.f32 %v318_v36  ;;  %v323_v38 = vadd.s32 3, %v319_v2  ;;  %v1434_v22 = vsub.s32 1, %v1428_v19 }
  0x6b   : > { %1063 = vsinq.f32 %v318_v36 }
  0x6c   : > { %1065 = vpow2.f32 %v334_v37  ;;  %v324_v43 = vand.u32 3, %v323_v38  ;;  %v1460_v58 = vrot.slane %v1331_v5, %v1434_v22 }
  0x6e   : > { %443 = vperm.xlu1 %1058, %v365_v27   ;;  %vm329_vm9 = vcmp.eq.s32.totalorder %v324_v43, 2  ;;  %vm326_vm10 = vcmp.eq.s32.totalorder %v324_v43, 0  ;;  %vm325_vm11 = vcmp.lt.s32.totalorder %v324_v43, 2 }
  0x72   : > { %439 = vperm.xlu1 %1058, %v364_v3  }
  0x77   : > { %v1062_v48 = vpop.eup %1061 }
  0x78   : > { %v1064_v51 = vpop.eup %1063  ;;  %v330_v52 = vxor.u32 2147483648, %v1062_v48 }
  0x79   : > { %v327_v55 = vxor.u32 2147483648, %v1064_v51  ;;  %v1066_v59 = vpop.eup %1065 }
  0x7a   : > { %v331_v56 = vsel %vm329_vm9, %v330_v52, %v1064_v51  ;;  %v350_v8 = vmul.f32 %v1066_v59, %v349_v62 }
  0x7b   : > { %v328_v60 = vsel %vm326_vm10, %v1062_v48, %v327_v55 }
  0x7c   : > { %v332_v0 = vsel %vm325_vm11, %v328_v60, %v331_v56  ;;  %v1456_v56 = vrot.slane %v1331_v5, %v1431_v21 }
  0x7d   : > { %v333_v3 = vsel %vm322_vm12, nan, %v332_v0 }
  0x7e   : > { %v347_v7 = vmul.f32 %v346_v61, %v333_v3 }
  0x80   : > { %v348_v12 = vadd.f32 %v347_v7, %v345_v1 }
  0x82   : > { %v1425_v14 = vadd.f32 %v350_v8, %v348_v12 }
  0x84   : > { %v360_v16 = vmul.f32 %v958_v13, %v1425_v14 }
  0x86   : > { %v361_v17 = vadd.f32 %v360_v16, %v359_v15 }
  0x88   : > { %v363_v23 = vadd.f32 %v362_v20, %v361_v17 }
  0x8a   : > { %v1437_v26 = vrot.slane %v363_v23, %v1431_v21  ;;  %v1440_v27 = vrot.slane %v363_v23, %v1434_v22 }
  0xa1   : > { %v566_v24 = vpop.permute.xlu1 %565  ;;  %v562_v25 = vpop.permute.xlu0 %561 }
  0xa6   : > { %v524_v28 = vpop.permute.xlu0 %523  ;;  %v514_v29 = vpop.permute.xlu1 %513 }
  0xa7   : > { %v538_v30 = vmul.f32 %v524_v28, %v1437_v26  ;;  %v539_v31 = vmul.f32 %v524_v28, %v1440_v27  ;;  %v534_v2 = vmul.f32 %v514_v29, %v1437_v26  ;;  %v535_v9 = vmul.f32 %v514_v29, %v1440_v27 }
  0xa9   : > { %v580_v32 = vadd.f32 %v566_v24, %v538_v30  ;;  %v581_v4 = vadd.f32 %v566_v24, %v539_v31 }
  0xaa   : > { %v509_v33 = vpop.permute.xlu1 %508  ;;  %v519_v34 = vpop.permute.xlu0 %518 }
  0xab   : > { %1067 = vtanh.f32 %v580_v32  ;;  %v536_v35 = vmul.f32 %v519_v34, %v1437_v26  ;;  %v537_v36 = vmul.f32 %v519_v34, %v1440_v27  ;;  %v532_v43 = vmul.f32 %v509_v33, %v1437_v26 }
  0xac   : > { %1069 = vtanh.f32 %v581_v4  ;;  %v533_v44 = vmul.f32 %v509_v33, %v1440_v27 }
  0xad   : > { %v578_v37 = vadd.f32 %v562_v25, %v536_v35  ;;  %v579_v38 = vadd.f32 %v562_v25, %v537_v36 }
  0xae   : > { %v504_v39 = vpop.permute.xlu0 %503 }
  0xaf   : > { %1071 = vtanh.f32 %v578_v37  ;;  %v558_v40 = vpop.permute.xlu1 %557  ;;  %v530_v51 = vmul.f32 %v504_v39, %v1437_v26  ;;  %v531_v52 = vmul.f32 %v504_v39, %v1440_v27 }
  0xb0   : > { %1073 = vtanh.f32 %v579_v38  ;;  %v576_v41 = vadd.f32 %v558_v40, %v534_v2  ;;  %v577_v42 = vadd.f32 %v558_v40, %v535_v9 }
  0xb2   : > { %1075 = vtanh.f32 %v576_v41  ;;  %v422_v45 = vpop.permute.xlu0 %421 }
  0xb3   : > { %1077 = vtanh.f32 %v577_v42  ;;  %v554_v46 = vpop.permute.xlu1 %553  ;;  %v436_v3 = vmul.f32 %v422_v45, %v1456_v56  ;;  %v437_v8 = vmul.f32 %v422_v45, %v1460_v58 }
  0xb4   : > { %v574_v47 = vadd.f32 %v554_v46, %v532_v43  ;;  %v575_v48 = vadd.f32 %v554_v46, %v533_v44 }
  0xb6   : > { %1079 = vtanh.f32 %v574_v47  ;;  %v1450_v49 = vpop.permute.xlu0 %406 }
  0xb7   : > { %1081 = vtanh.f32 %v575_v48  ;;  %v431_v9 = vmul.f32 %v1450_v49, %v1460_v58  ;;  %v430_v47 = vmul.f32 %v1450_v49, %v1456_v56 }
  0xb8   : > { %v1068_v50 = vpop.eup %1067  ;;  %v499_v53 = vpop.permute.xlu1 %498 }
  0xb9   : > { %v1070_v54 = vpop.eup %1069  ;;  %v636_v55 = vmul.f32 %v1068_v50, %v1068_v50  ;;  %v528_v10 = vmul.f32 %v499_v53, %v1437_v26  ;;  %v529_v11 = vmul.f32 %v499_v53, %v1440_v27 }
  0xba   : > { %648 = vmatprep.subr.mxu0 %v1070_v54  ;;  %v637_v57 = vmul.f32 %v1070_v54, %v1070_v54 }
  0xbb   : > { %649 = vmatpush1.msra.mxu0 %v1068_v50  ;;  %v550_v59 = vpop.permute.xlu0 %549 }
  0xbc   : > { %v1072_v60 = vpop.eup %1071  ;;  %722 = vmatprep.subr.mxu1 %v637_v57  ;;  %v494_v61 = vpop.permute.xlu1 %493  ;;  %v572_v62 = vadd.f32 %v550_v59, %v530_v51  ;;  %v573_v63 = vadd.f32 %v550_v59, %v531_v52 }
  0xbd   : > { %v1074_v0 = vpop.eup %1073  ;;  %723 = vmatpush1.msra.mxu1 %v636_v55  ;;  %v634_v1 = vmul.f32 %v1072_v60, %v1072_v60  ;;  %v526_v28 = vmul.f32 %v494_v61, %v1437_v26  ;;  %v527_v29 = vmul.f32 %v494_v61, %v1440_v27 }
  0xbe   : > { %650 = vmatprep.subr.mxu0 %v1074_v0  ;;  %1083 = vtanh.f32 %v572_v62  ;;  %v635_v6 = vmul.f32 %v1074_v0, %v1074_v0 }
  0xbf   : > { %v1076_v7 = vpop.eup %1075  ;;  %1085 = vtanh.f32 %v573_v63  ;;  %651 = vmatpush1.msra.mxu0 %v1072_v60  ;;  %v464_v16 = vpop.permute.xlu0 %463 }
  0xc0   : > { %v1078_v5 = vpop.eup %1077  ;;  %724 = vmatprep.subr.mxu1 %v635_v6  ;;  %v632_v12 = vmul.f32 %v1076_v7, %v1076_v7  ;;  %v478_v20 = vadd.f32 %v464_v16, %v436_v3  ;;  %v479_v24 = vadd.f32 %v464_v16, %v437_v8 }
  0xc1   : > { %652 = vmatprep.subr.mxu0 %v1078_v5  ;;  %v546_v13 = vpop.permute.xlu1 %545  ;;  %725 = vmatpush1.msra.mxu1 %v634_v1  ;;  %v633_v15 = vmul.f32 %v1078_v5, %v1078_v5 }
  0xc2   : > { %v570_v17 = vadd.f32 %v546_v13, %v528_v10  ;;  %v571_v18 = vadd.f32 %v546_v13, %v529_v11  ;;  %653 = vmatpush1.msra.mxu0 %v1076_v7 }
  0xc3   : > { %v1080_v23 = vpop.eup %1079  ;;  %726 = vmatprep.subr.mxu1 %v633_v15  ;;  %v452_v39 = vpop.permute.xlu0 %451 }
  0xc4   : > { %v1082_v25 = vpop.eup %1081  ;;  %1087 = vtanh.f32 %v570_v17  ;;  %727 = vmatpush1.msra.mxu1 %v632_v12  ;;  %v630_v30 = vmul.f32 %v1080_v23, %v1080_v23  ;;  %v473_v52 = vadd.f32 %v452_v39, %v431_v9  ;;  %v472_v49 = vadd.f32 %v452_v39, %v430_v47 }
  0xc5   : > { %1089 = vtanh.f32 %v571_v18  ;;  %654 = vmatprep.subr.mxu0 %v1082_v25  ;;  %v542_v31 = vpop.permute.xlu1 %541  ;;  %v631_v32 = vmul.f32 %v1082_v25, %v1082_v25  ;;  %v1218_v47 = vmov 1966171168  }
  0xc6   : > { %1091 = vtanh.f32 %v478_v20  ;;  %v568_v4 = vadd.f32 %v542_v31, %v526_v28  ;;  %v569_v33 = vadd.f32 %v542_v31, %v527_v29  ;;  %655 = vmatpush1.msra.mxu0 %v1080_v23 }
  0xc7   : > { %1093 = vtanh.f32 %v479_v24  ;;  %728 = vmatprep.subr.mxu1 %v631_v32 }
  0xc8   : > { %1095 = vtanh.f32 %v568_v4  ;;  %729 = vmatpush1.msra.mxu1 %v630_v30  ;;  %v392_v18 = vpop.permute.xlu0 %391 }
  0xc9   : > { %1097 = vtanh.f32 %v569_v33  ;;  %v424_v4 = vmul.f32 %v392_v18, %v1456_v56  ;;  %v425_v33 = vmul.f32 %v392_v18, %v1460_v58 }
  0xca   : > { %v417_v34 = vpop.permute.xlu1 %416 }
  0xcb   : > { %v1084_v26 = vpop.eup %1083  ;;  %v434_v40 = vmul.f32 %v417_v34, %v1456_v56  ;;  %v435_v41 = vmul.f32 %v417_v34, %v1460_v58 }
  0xcc   : > { %v1086_v35 = vpop.eup %1085  ;;  %v628_v27 = vmul.f32 %v1084_v26, %v1084_v26 }
  0xcd   : > { %656 = vmatprep.subr.mxu0 %v1086_v35  ;;  %v629_v36 = vmul.f32 %v1086_v35, %v1086_v35 }
  0xce   : > { %v412_v37 = vpop.permute.xlu1 %411  ;;  %657 = vmatpush1.msra.mxu0 %v1084_v26 }
  0xcf   : > { %730 = vmatprep.subr.mxu1 %v629_v36  ;;  %v432_v54 = vmul.f32 %v412_v37, %v1456_v56  ;;  %v433_v55 = vmul.f32 %v412_v37, %v1460_v58 }
  0xd0   : > { %731 = vmatpush1.msra.mxu1 %v628_v27 }
  0xd1   : > { %v1088_v2 = vpop.eup %1087 }
  0xd2   : > { %v1090_v38 = vpop.eup %1089  ;;  %v626_v42 = vmul.f32 %v1088_v2, %v1088_v2 }
  0xd3   : > { %v1092_v43 = vpop.eup %1091  ;;  %658 = vmatprep.subr.mxu0 %v1090_v38  ;;  %v460_v44 = vpop.permute.xlu1 %459  ;;  %v627_v45 = vmul.f32 %v1090_v38, %v1090_v38 }
  0xd4   : > { %v1094_v46 = vpop.eup %1093  ;;  %v476_v48 = vadd.f32 %v460_v44, %v434_v40  ;;  %v477_v50 = vadd.f32 %v460_v44, %v435_v41  ;;  %659 = vmatpush1.msra.mxu0 %v1088_v2  ;;  %v622_v0 = vmul.f32 %v1092_v43, %v1092_v43 }
  0xd5   : > { %v1096_v51 = vpop.eup %1095  ;;  %732 = vmatprep.subr.mxu1 %v627_v45  ;;  %v623_v61 = vmul.f32 %v1094_v46, %v1094_v46 }
  0xd6   : > { %v1098_v53 = vpop.eup %1097  ;;  %1099 = vtanh.f32 %v476_v48  ;;  %733 = vmatpush1.msra.mxu1 %v626_v42  ;;  %v624_v57 = vmul.f32 %v1096_v51, %v1096_v51  ;;  %v807_v48 = vunpack.c.l.s4 %v1218_v47 }
  0xd7   : > { %1101 = vtanh.f32 %v477_v50  ;;  %660 = vmatprep.subr.mxu0 %v1098_v53  ;;  %v456_v59 = vpop.permute.xlu1 %455  ;;  %v625_v60 = vmul.f32 %v1098_v53, %v1098_v53 }
  0xd8   : > { %v474_v62 = vadd.f32 %v456_v59, %v432_v54  ;;  %v475_v63 = vadd.f32 %v456_v59, %v433_v55  ;;  %661 = vmatpush1.msra.mxu0 %v1096_v51  ;;  %1103 = vtanh.f32 %v473_v52  ;;  %v808_v52 = vunpack.c.0.s8 %v807_v48 }
  0xd9   : > { %662 = vmatprep.subr.mxu0 %v1094_v46  ;;  %734 = vmatprep.subr.mxu1 %v625_v60  ;;  %v639_v46 = vld [vmem:[%s1528_s2 + $0x8] sm:$0xff]  ;;  %v800_v54 = vstv %s969_s30 }
  0xda   : > { %1105 = vtanh.f32 %v474_v62  ;;  %663 = vmatpush1.msra.mxu0 %v1092_v43  ;;  %735 = vmatpush1.msra.mxu1 %v624_v57  ;;  %v638_v43 = vld [vmem:[%s1528_s2] sm:$0xff]  ;;  %v793_v62 = vstv %s968_s5 }
  0xdb   : > { %1107 = vtanh.f32 %v475_v63  ;;  %736 = vmatprep.subr.mxu1 %v623_v61  ;;  %v798_v63 = vand.u32 2147483647, %v1425_v14 }
  0xdc   : > { %1109 = vtanh.f32 %v472_v49  ;;  %737 = vmatpush1.msra.mxu1 %v622_v0  ;;  %v402_v1 = vpop.permute.xlu1 %401  ;;  %v811_v49 = vsub.s32 %v808_v52, %v1428_v19 }
  0xdd   : > { %v428_v8 = vmul.f32 %v402_v1, %v1456_v56  ;;  %v429_v5 = vmul.f32 %v402_v1, %v1460_v58 }
  0xe0   : > { %v397_v3 = vpop.permute.xlu1 %396 }
  0xe1   : > { %v426_v23 = vmul.f32 %v397_v3, %v1456_v56  ;;  %v427_v24 = vmul.f32 %v397_v3, %v1460_v58 }
  0xe3   : > { %v1100_v6 = vpop.eup %1099 }
  0xe4   : > { %v1102_v7 = vpop.eup %1101  ;;  %v620_v10 = vmul.f32 %v1100_v6, %v1100_v6 }
  0xe5   : > { %664 = vmatprep.subr.mxu0 %v1102_v7  ;;  %v448_v11 = vpop.permute.xlu1 %447  ;;  %v621_v12 = vmul.f32 %v1102_v7, %v1102_v7  ;;  %v1104_v13 = vpop.eup %1103 }
  0xe6   : > { %v470_v15 = vadd.f32 %v448_v11, %v428_v8  ;;  %v471_v16 = vadd.f32 %v448_v11, %v429_v5  ;;  %665 = vmatpush1.msra.mxu0 %v1100_v6  ;;  %v617_v34 = vmul.f32 %v1104_v13, %v1104_v13  ;;  %v799_v5 = vmul.f32 0.25, %v798_v63 }
  0xe7   : > { %v1106_v17 = vpop.eup %1105  ;;  %738 = vmatprep.subr.mxu1 %v621_v12 }
  0xe8   : > { %v1108_v20 = vpop.eup %1107  ;;  %1111 = vtanh.f32 %v470_v15  ;;  %739 = vmatpush1.msra.mxu1 %v620_v10  ;;  %v618_v25 = vmul.f32 %v1106_v17, %v1106_v17 }
  0xe9   : > { %v1110_v28 = vpop.eup %1109  ;;  %1113 = vtanh.f32 %v471_v16  ;;  %666 = vmatprep.subr.mxu0 %v1108_v20  ;;  %v444_v29 = vpop.permute.xlu1 %443  ;;  %v619_v30 = vmul.f32 %v1108_v20, %v1108_v20 }
  0xea   : > { %v468_v31 = vadd.f32 %v444_v29, %v426_v23  ;;  %v469_v32 = vadd.f32 %v444_v29, %v427_v24  ;;  %667 = vmatpush1.msra.mxu0 %v1106_v17  ;;  %v616_v26 = vmul.f32 %v1110_v28, %v1110_v28 }
  0xeb   : > { %668 = vmatprep.subr.mxu0 %v1104_v13  ;;  %740 = vmatprep.subr.mxu1 %v619_v30 }
  0xec   : > { %1115 = vtanh.f32 %v468_v31  ;;  %669 = vmatpush1.msra.mxu0 %v1110_v28  ;;  %741 = vmatpush1.msra.mxu1 %v618_v25 }
  0xed   : > { %1117 = vtanh.f32 %v469_v32  ;;  %742 = vmatprep.subr.mxu1 %v617_v34  ;;  %v440_v35 = vpop.permute.xlu1 %439 }
  0xee   : > { %v466_v27 = vadd.f32 %v440_v35, %v424_v4  ;;  %v467_v36 = vadd.f32 %v440_v35, %v425_v33  ;;  %743 = vmatpush1.msra.mxu1 %v616_v26 }
  0xf0   : > { %1119 = vtanh.f32 %v466_v27 }
  0xf1   : > { %1121 = vtanh.f32 %v467_v36 }
  0xf5   : > { %v1112_v37 = vpop.eup %1111 }
  0xf6   : > { %v1114_v2 = vpop.eup %1113  ;;  %v614_v56 = vmul.f32 %v1112_v37, %v1112_v37 }
  0xf7   : > { %670 = vmatprep.subr.mxu0 %v1114_v2  ;;  %v615_v58 = vmul.f32 %v1114_v2, %v1114_v2 }
  0xf8   : > { %671 = vmatpush1.msra.mxu0 %v1112_v37 }
  0xf9   : > { %v1116_v9 = vpop.eup %1115  ;;  %744 = vmatprep.subr.mxu1 %v615_v58 }
  0xfa   : > { %v1118_v38 = vpop.eup %1117  ;;  %745 = vmatpush1.msra.mxu1 %v614_v56  ;;  %v612_v39 = vmul.f32 %v1116_v9, %v1116_v9 }
  0xfb   : > { %672 = vmatprep.subr.mxu0 %v1118_v38  ;;  %v613_v40 = vmul.f32 %v1118_v38, %v1118_v38 }
  0xfc   : > { %673 = vmatpush1.msra.mxu0 %v1116_v9 }
  0xfd   : > { %v1120_v41 = vpop.eup %1119  ;;  %746 = vmatprep.subr.mxu1 %v613_v40 }
  0xfe   : > { %v1122_v42 = vpop.eup %1121  ;;  %747 = vmatpush1.msra.mxu1 %v612_v39  ;;  %v610_v44 = vmul.f32 %v1120_v41, %v1120_v41 }
  0xff   : > { %674 = vmatprep.subr.mxu0 %v1122_v42  ;;  %v611_v45 = vmul.f32 %v1122_v42, %v1122_v42 }
 0x100   : > { %675 = vmatpush1.msra.mxu0 %v1120_v41 }
 0x101   : > { %974 = vmatmul.mubr.msk.f32.vlgmr.msra.gmra.mxu0 %vm640_vm13, %v638_v43  ;;  %748 = vmatprep.subr.mxu1 %v611_v45 }
 0x102   : > { %749 = vmatpush1.msra.mxu1 %v610_v44 }
 0x103   : > { %975 = vmatmul.mubr.msk.f32.vlgmr.msra.gmra.mxu1 %vm640_vm13, %v639_v46 }
 0x1c1   : > { %v710_v50 = vpop.f32.mrf.mxu0 }
 0x1c2   : > { %v789_v57 = vmul.f32 0.5, %v710_v50 }
 0x1c3   : > { %v784_v51 = vpop.f32.mrf.mxu1  ;;  %v712_v53 = vpop.f32.mrf.mxu0 }
 0x1c4   : > { %v790_v59 = vmul.f32 0.5, %v712_v53  ;;  %v801_v60 = vsub.f32 %v800_v54, %v784_v51  ;;  %v791_v1 = vadd.f32 0.5, %v789_v57  ;;  %v794_v7 = vsub.f32 %v793_v62, %v784_v51 }
 0x1c5   : > { %v786_v55 = vpop.f32.mrf.mxu1 }
 0x1c6   : > { %v802_v61 = vsub.f32 %v800_v54, %v786_v55  ;;  %v792_v3 = vadd.f32 0.5, %v790_v59  ;;  %v795_v8 = vsub.f32 %v793_v62, %v786_v55  ;;  %vm823_vm14 = vcmp.ge.f32.partialorder %v791_v1, 0.0 }
 0x1c7   : > { %vm825_vm15 = vcmp.le.f32.partialorder %v791_v1, 1.0  ;;  %v796_v12 = vmul.f32 0.25, %v794_v7 }
 0x1c8   : > { %v805_v0 = vcombine.low %v801_v60, %v802_v61  ;;  %vm824_vm0 = vcmp.ge.f32.partialorder %v792_v3, 0.0  ;;  %vm826_vm1 = vcmp.le.f32.partialorder %v792_v3, 1.0  ;;  %vm827_vm2 = vmand %vm823_vm14, %vm825_vm15  ;;  %v797_v19 = vmul.f32 0.25, %v795_v8 }
 0x1c9   : > { %vm828_vm3 = vmand %vm824_vm0, %vm826_vm1  ;;  %v829_v16 = vsel %vm827_vm2, %v796_v12, 1e-08 }
 0x1ca   : > { %v812_v6 = vrot.slane %v805_v0, %v811_v49  ;;  %v830_v17 = vsel %vm828_vm3, %v797_v19, 1e-08 }
 0x1cc   : > { %v813_v10 = vcombine.high %v812_v6, %v812_v6 }
 0x1ce   : > { %v820_v11 = vrot.slane %v813_v10, %v811_v49 }
 0x1d0   : > { %v822_v13 = vmul.f32 %v820_v11, %v799_v5 }
 0x1d2   : > { %v835_v14 = vrot.slane %v822_v13, %v1431_v21  ;;  %v839_v15 = vrot.slane %v822_v13, %v1434_v22 }
 0x1d4   : > { %v842_v18 = vsel %vm827_vm2, %v835_v14, 1e-08  ;;  %v843_v20 = vsel %vm828_vm3, %v839_v15, 1e-08 }
 0x1d5   : > { %v845_v23 = vsel %vm844_vm4, %v829_v16, %v842_v18  ;;  %v846_v24 = vsel %vm844_vm4, %v830_v17, %v843_v20 }
 0x1d6   : > { %1123 = vlog2.f32 %v845_v23 }
 0x1d7   : > { %1125 = vlog2.f32 %v846_v24 }
 0x1e3   : > { %v1124_v25 = vpop.eup %1123 }
 0x1e4   : > { %v1126_v28 = vpop.eup %1125  ;;  %v848_v29 = vmul.f32 0.6931472, %v1124_v25 }
 0x1e5   : > { %v850_v21 = vmul.f32 0.6931472, %v1126_v28 }
 0x1e7   : > { %v853_v22 = vcombine.low %v848_v29, %v850_v21 }
 0x1e9   : > { %976 = vst.sshfl [vmem:[%s205_s9] sm:$0x33 pattern:$0x76325410] %v853_v22 }
 0x1ea   : > { %1155 = shalt.err (!%p1152_p2)
}
 0x1eb   : > { %s1156_s27 = scalar_lea.hbm %s876_s13, 64  ;;  %s1160_s30 = scalar_lea.hbm %s1530_s4, 192 }
 0x1ec   : > { %p1157_p3 = scmp.ne.s32.totalorder %s876_s13, %s1156_s27  ;;  %p1161_p8 = scmp.lt.s32.totalorder %s876_s13, %s1530_s4 }
 0x1ed   : > { %p1162_p10 = scmp.lt.s32.totalorder %s1160_s30, %s1156_s27 }
 0x1ee   : > { %p1158_p4 = pnand %p1157_p3, %p1283_p5 }
 0x1ef   : > { %p1163_p9 = por %p1162_p10, %p1161_p8 }
 0x1f0   : > { %p1159_p7 = pneg %p1158_p4 }
 0x1f2   : > { %p1164_p11 = pnand %p1163_p9, %p1159_p7 }
 0x1f4   : > { %1167 = shalt.err (!%p1164_p11)
}
 0x1f5   : > { %991 = dma.vmem_to_hbm [thread:$0]  (%p1283_p5), %s879_s10, 64, %s876_s13, %s864_s14  }
 0x1f6 PF: > { %p1003_p12 = scmp.ge.s32.totalorder %s1206_s18, 2  ;;  %s890_s7 = sand.u32 1, %s1194_s15  }
 0x1f7   : > { %s891_s8 = scalar_lea.sflag [#allocation3], %s890_s7 }
 0x1f8   : > { %p998_p13 = pnand %p1003_p12, %p1287_p6 }
 0x1fa   : > { %p999_p0 = pneg %p998_p13 }
 0x1fc   : > { %1189 = dma.done.wait (%p999_p0), %s891_s8, 64  }
 0x1fd   : > { %1191 = vsyncadd (%p999_p0), %s891_s8, 4294967232  ;;  %p15_p1 = scmp.ge.s32.totalorder %s1270_s21, 5   ;;  %s1536_s15 = smov %s1198_s16 }
 0x1fe   : > { %s1537_s16 = smov %s1202_s17  ;;  %s1538_s17 = smov %s1281_s24 }
 0x1ff   : > { %s1539_s18 = smov %s1270_s21  ;;  %17 = sbr.rel (!%p15_p1) target bundleno = 4 (0x4), region = 77 }
 0x204   :  { %896 = vsyncpa [#allocation3], 1 }
 0x205   :  { %898 = vsyncpa [#allocation3 + $0x1], 1 }
 0x206   :  { %899 = vsyncpa [#allocation4], 1 }
 0x207   :  { %901 = vsyncpa [#allocation4 + $0x1], 1 }

</bundles_post_ra>
